<compile_context>
chip_gen: v5e
topology: v5e:2x2
jax: 0.10.0
libtpu: 0.0.40
codegen_flags: <defaults>
</compile_context>

<pallas_src>
import jax
import jax.numpy as jnp
from jax.experimental import pallas as pl
from jax.experimental.pallas import tpu as pltpu

W_CLS = 1.0
W_METRIC = 4.0
MARGIN = 0.3


def fusion_loss(features, logits, labels, *, class_tile=1024, num_class_chunks=2):
    """W_CLS * softmax-CE(logits, labels) + W_METRIC * batch-hard triplet(features, labels)."""
    B, D = features.shape
    C = logits.shape[1]

    # Lane-dense class tiling.  No padding of logits: ragged tiles are masked in-kernel.
    if C <= class_tile:
        tc = C                                      # single tile; "equal full dim" layout rule
    else:
        tc = max(128, (class_tile // 128) * 128)    # multiple of 128 lanes
    n_tiles = pl.cdiv(C, tc)

    # Leading "parallel" chunk axis: lets v7x split the class sweep across both TCs.
    # Per-chunk (m, s, t) partials are merged with an explicit logsumexp merge below.
    P = max(1, min(num_class_chunks, n_tiles))
    nc_inner = pl.cdiv(n_tiles, P)

    labels = labels.astype(jnp.int32)
    lab_row = labels.reshape(B, 1)
    lab_col = labels.reshape(1, B)

    def kernel(feat_ref, logits_ref, lab_row_ref, lab_col_ref,
               m_ref, s_ref, t_ref, tri_ref):
        p = pl.program_id(0)
        c = pl.program_id(1)
        tc_k = logits_ref.shape[-1]
        tile_idx = p * pl.num_programs(1) + c

        @pl.when(c == 0)
        def _init_and_triplet():
            # Per-chunk accumulator init (outputs double as accumulators).
            m_ref[...] = jnp.full_like(m_ref, jnp.finfo(jnp.float32).min)
            s_ref[...] = jnp.zeros_like(s_ref)
            t_ref[...] = jnp.zeros_like(t_ref)

            # Batch-hard triplet loss, hoisted to chunk step 0 so it hides under the
            # logits DMA pipeline (features block is already resident).
            feats = feat_ref[...]                                   # native dtype to MXU
            f32 = feats.astype(jnp.float32)
            fsq = f32 * f32
            sq_row = jnp.sum(fsq, axis=-1, keepdims=True)           # (B, 1)
            ones_row = jnp.ones((1, fsq.shape[-1]), jnp.float32)
            sq_col = jax.lax.dot_general(                            # (1, B) via tiny matmul
                ones_row, fsq, dimension_numbers=(((1,), (1,)), ((), ())),
                preferred_element_type=jnp.float32)
            gram = jax.lax.dot_general(                              # (B, B) NT contraction
                feats, feats, dimension_numbers=(((1,), (1,)), ((), ())),
                preferred_element_type=jnp.float32)
            d2 = jnp.maximum(sq_row + sq_col - 2.0 * gram, 0.0)
            same = lab_row_ref[...] == lab_col_ref[...]              # (B, B) bool
            hp2 = jnp.max(jnp.where(same, d2, 0.0), axis=-1, keepdims=True)
            hn2 = jnp.min(jnp.where(same, 1e18, d2), axis=-1, keepdims=True)
            hinge = jnp.maximum(
                jnp.sqrt(hp2 + 1e-12) - jnp.sqrt(hn2 + 1e-12) + MARGIN, 0.0)
            tri_ref[...] = jnp.sum(hinge, axis=0, keepdims=True) / jnp.float32(B)

        # ---------- online softmax cross-entropy over one class tile (ragged-safe) ----------
        logits_f = logits_ref[...].astype(jnp.float32)               # (B, tc_k)
        col = jax.lax.broadcasted_iota(jnp.int32, (B, tc_k), 1)
        valid = col < (C - tile_idx * tc_k)                          # scalar RHS compare

        tile_max = jnp.max(jnp.where(valid, logits_f, -jnp.inf),
                           axis=-1, keepdims=True)                   # (B, 1)
        m_new = jnp.maximum(m_ref[...], tile_max)
        corr = jnp.exp(m_ref[...] - m_new)
        probs = jnp.where(valid, jnp.exp(logits_f - m_new), 0.0)
        s_ref[...] = s_ref[...] * corr + jnp.sum(probs, axis=-1, keepdims=True)
        m_ref[...] = m_new

        # Target logit: compare+select on the VPU; label offset by the tile origin.
        tgt_local = lab_row_ref[...] - tile_idx * tc_k               # (B, 1)
        t_ref[...] += jnp.sum(jnp.where(col == tgt_local, logits_f, 0.0),
                              axis=-1, keepdims=True)

    # VMEM budget: double-buffered logits tile + f32 temporaries dominate; raise the
    # scoped limit above v5e's 16 MiB default, capped below v7x's 64 MiB physical.
    logit_buf = B * tc * logits.dtype.itemsize
    feat_buf = B * D * features.dtype.itemsize
    budget = 3 * logit_buf + 2 * feat_buf + 4 * B * tc * 4 + 4 * B * B * 4 + (2 << 20)
    vmem_limit = int(min(max(budget, 32 << 20), 48 << 20))

    cost = pl.CostEstimate(
        flops=int(2 * B * B * D * P + 6 * B * C),
        transcendentals=int(B * C + 4 * B),
        bytes_accessed=int(B * C * logits.dtype.itemsize
                           + B * D * features.dtype.itemsize + 16 * B),
    )

    m_out, s_out, t_out, tri_out = pl.pallas_call(
        kernel,
        out_shape=(
            jax.ShapeDtypeStruct((P, B, 1), jnp.float32),   # per-chunk running max
            jax.ShapeDtypeStruct((P, B, 1), jnp.float32),   # per-chunk sum of exp
            jax.ShapeDtypeStruct((P, B, 1), jnp.float32),   # per-chunk target-logit sum
            jax.ShapeDtypeStruct((P, 1, 1), jnp.float32),   # per-chunk triplet loss
        ),
        grid_spec=pltpu.PrefetchScalarGridSpec(
            num_scalar_prefetch=0,
            grid=(P, nc_inner),
            in_specs=[
                pl.BlockSpec((B, D), lambda p, c: (0, 0)),        # features: resident block
                pl.BlockSpec((B, tc),                              # logits: pipelined over C
                             lambda p, c: (0, jnp.minimum(p * nc_inner + c, n_tiles - 1))),
                pl.BlockSpec((B, 1), lambda p, c: (0, 0)),        # labels as column
                pl.BlockSpec((1, B), lambda p, c: (0, 0)),        # labels as row
            ],
            out_specs=[
                pl.BlockSpec((None, B, 1), lambda p, c: (p, 0, 0)),
                pl.BlockSpec((None, B, 1), lambda p, c: (p, 0, 0)),
                pl.BlockSpec((None, B, 1), lambda p, c: (p, 0, 0)),
                pl.BlockSpec((None, 1, 1), lambda p, c: (p, 0, 0)),
            ],
            scratch_shapes=[],
        ),
        compiler_params=pltpu.CompilerParams(
            dimension_semantics=("parallel", "arbitrary"),
            vmem_limit_bytes=vmem_limit,
        ),
        cost_estimate=cost,
    )(features, logits, lab_row, lab_col)

    # Tiny scalar epilogue: explicit logsumexp merge of the per-chunk partials.
    m = m_out[..., 0]                                   # (P, B)
    s = s_out[..., 0]
    t = t_out[..., 0]
    m_tot = jnp.max(m, axis=0)                          # (B,)
    s_tot = jnp.sum(s * jnp.exp(m - m_tot[None, :]), axis=0)
    ce = jnp.mean(m_tot + jnp.log(s_tot) - jnp.sum(t, axis=0))
    return W_CLS * ce + W_METRIC * tri_out[0, 0, 0]


def fusion_loss_ref(features, logits, labels):
    # Pure-JAX reference with identical semantics.
    feats = features.astype(jnp.float32)
    logits = logits.astype(jnp.float32)
    lse = jax.nn.logsumexp(logits, axis=-1)
    tgt = jnp.take_along_axis(logits, labels[:, None], axis=-1)[:, 0]
    ce = jnp.mean(lse - tgt)
    d2 = (
        jnp.sum(feats * feats, axis=-1)[:, None]
        + jnp.sum(feats * feats, axis=-1)[None, :]
        - 2.0 * feats @ feats.T
    )
    dist = jnp.sqrt(jnp.maximum(d2, 0.0) + 1e-12)
    same = (labels[:, None] == labels[None, :]).astype(jnp.float32)
    hp = jnp.max(dist * same, axis=-1)
    hn = jnp.min(dist + same * 1e9, axis=-1)
    tri = jnp.mean(jnp.maximum(hp - hn + MARGIN, 0.0))
    return W_CLS * ce + W_METRIC * tri


if __name__ == "__main__":
    key = jax.random.PRNGKey(0)
    k_feat, k_logit, k_feat2, k_logit2 = jax.random.split(key, 4)

    # Small canonical shapes (single class tile equal to the full class dim).
    B, D, C = 8, 32, 4
    features = jax.random.normal(k_feat, (B, D), dtype=jnp.float32)
    logits = jax.random.normal(k_logit, (B, C), dtype=jnp.float32)
    labels = jnp.array([0, 0, 1, 1, 2, 2, 3, 3], dtype=jnp.int32)

    loss = jax.block_until_ready(fusion_loss(features, logits, labels))
    ref = fusion_loss_ref(features, logits, labels)
    assert jnp.allclose(loss, ref, rtol=1e-4, atol=1e-4), (loss, ref)

    # Ragged class axis, no wrapper pad: C=1000 with 256-lane tiles -> 4 tiles split
    # across 2 "parallel" chunks (exercises the in-kernel mask + logsumexp merge).
    C2 = 1000
    features2 = jax.random.normal(k_feat2, (B, D), dtype=jnp.float32)
    logits2 = jax.random.normal(k_logit2, (B, C2), dtype=jnp.float32)
    loss2 = jax.block_until_ready(
        fusion_loss(features2, logits2, labels, class_tile=256))
    ref2 = fusion_loss_ref(features2, logits2, labels)
    assert jnp.allclose(loss2, ref2, rtol=1e-4, atol=1e-4), (loss2, ref2)

    # Odd tile count (3 tiles of 384 over 2 chunks) -> exercises the fully-masked
    # overflow tile on the second chunk.
    loss3 = jax.block_until_ready(
        fusion_loss(features2, logits2, labels, class_tile=384))
    assert jnp.allclose(loss3, ref2, rtol=1e-4, atol=1e-4), (loss3, ref2)

    # bf16 logits (halves the dominant HBM read); LSE math stays f32 in-kernel.
    logits_bf16 = logits2.astype(jnp.bfloat16)
    loss4 = jax.block_until_ready(
        fusion_loss(features2, logits_bf16, labels, class_tile=256))
    ref4 = fusion_loss_ref(features2, logits_bf16.astype(jnp.float32), labels)
    assert jnp.allclose(loss4, ref4, rtol=1e-4, atol=1e-4), (loss4, ref4)

    print("KERNEL_OK")
</pallas_src>

<mosaic_0001>
module attributes {stable_mosaic.version = 11 : i64} {
  func.func @kernel(%arg0: i32, %arg1: i32, %arg2: memref<8x32xf32, #tpu.memory_space<vmem>>, %arg3: memref<8x4xf32, #tpu.memory_space<vmem>>, %arg4: memref<8x1xi32, #tpu.memory_space<vmem>>, %arg5: memref<1x8xi32, #tpu.memory_space<vmem>>, %arg6: memref<1x8x1xf32, #tpu.memory_space<vmem>>, %arg7: memref<1x8x1xf32, #tpu.memory_space<vmem>>, %arg8: memref<1x8x1xf32, #tpu.memory_space<vmem>>, %arg9: memref<1x1x1xf32, #tpu.memory_space<vmem>>) attributes {dimension_semantics = [#tpu.dimension_semantics<parallel>, #tpu.dimension_semantics<arbitrary>], iteration_bounds = array<i64: 1, 1>, scalar_prefetch = 0 : i64, scratch_operands = 0 : i64, tpu.core_type = #tpu.core_type<tc>, window_params = [{pipeline_mode = #tpu.pipeline_mode<synchronous>, transform_indices = @transform_0, window_bounds = array<i64: 8, 32>}, {transform_indices = @transform_1, window_bounds = array<i64: 8, 4>}, {pipeline_mode = #tpu.pipeline_mode<synchronous>, transform_indices = @transform_2, window_bounds = array<i64: 8, 1>}, {pipeline_mode = #tpu.pipeline_mode<synchronous>, transform_indices = @transform_3, window_bounds = array<i64: 1, 8>}, {transform_indices = @transform_4, window_bounds = array<i64: 1, 8, 1>}, {transform_indices = @transform_5, window_bounds = array<i64: 1, 8, 1>}, {transform_indices = @transform_6, window_bounds = array<i64: 1, 8, 1>}, {transform_indices = @transform_7, window_bounds = array<i64: 1, 1, 1>}]} {
    %c1_i32 = arith.constant 1 : i32
    %0 = arith.muli %arg0, %c1_i32 : i32
    %1 = arith.addi %0, %arg1 : i32
    %c0_i32 = arith.constant 0 : i32
    %2 = arith.cmpi eq, %arg1, %c0_i32 : i32
    %3 = arith.extui %2 : i1 to i32
    %c0_i32_0 = arith.constant 0 : i32
    %4 = arith.cmpi ne, %3, %c0_i32_0 : i32
    scf.if %4 {
      %cst_32 = arith.constant -3.40282347E+38 : f32
      %55 = vector.broadcast %cst_32 : f32 to vector<8x1xf32>
      %c0_33 = arith.constant 0 : index
      %c0_34 = arith.constant 0 : index
      %c0_35 = arith.constant 0 : index
      %56 = vector.load %arg6[%c0_33, %c0_34, %c0_35] : memref<1x8x1xf32, #tpu.memory_space<vmem>>, vector<1x8x1xf32>
      %57 = vector.shape_cast %56 : vector<1x8x1xf32> to vector<8x1xf32>
      %58 = vector.shape_cast %55 : vector<8x1xf32> to vector<1x8x1xf32>
      tpu.vector_store %arg6[%c0_33, %c0_34, %c0_35], %58 {strides = array<i32>} : memref<1x8x1xf32, #tpu.memory_space<vmem>>, vector<1x8x1xf32>,
      %cst_36 = arith.constant 0.000000e+00 : f32
      %59 = vector.broadcast %cst_36 : f32 to vector<8x1xf32>
      %c0_37 = arith.constant 0 : index
      %c0_38 = arith.constant 0 : index
      %c0_39 = arith.constant 0 : index
      %60 = vector.load %arg7[%c0_37, %c0_38, %c0_39] : memref<1x8x1xf32, #tpu.memory_space<vmem>>, vector<1x8x1xf32>
      %61 = vector.shape_cast %60 : vector<1x8x1xf32> to vector<8x1xf32>
      %62 = vector.shape_cast %59 : vector<8x1xf32> to vector<1x8x1xf32>
      tpu.vector_store %arg7[%c0_37, %c0_38, %c0_39], %62 {strides = array<i32>} : memref<1x8x1xf32, #tpu.memory_space<vmem>>, vector<1x8x1xf32>,
      %cst_40 = arith.constant 0.000000e+00 : f32
      %63 = vector.broadcast %cst_40 : f32 to vector<8x1xf32>
      %c0_41 = arith.constant 0 : index
      %c0_42 = arith.constant 0 : index
      %c0_43 = arith.constant 0 : index
      %64 = vector.load %arg8[%c0_41, %c0_42, %c0_43] : memref<1x8x1xf32, #tpu.memory_space<vmem>>, vector<1x8x1xf32>
      %65 = vector.shape_cast %64 : vector<1x8x1xf32> to vector<8x1xf32>
      %66 = vector.shape_cast %63 : vector<8x1xf32> to vector<1x8x1xf32>
      tpu.vector_store %arg8[%c0_41, %c0_42, %c0_43], %66 {strides = array<i32>} : memref<1x8x1xf32, #tpu.memory_space<vmem>>, vector<1x8x1xf32>,
      %c0_44 = arith.constant 0 : index
      %c0_45 = arith.constant 0 : index
      %67 = vector.load %arg2[%c0_44, %c0_45] : memref<8x32xf32, #tpu.memory_space<vmem>>, vector<8x32xf32>
      %68 = arith.mulf %67, %67 : vector<8x32xf32>
      %cst_46 = arith.constant dense<0.000000e+00> : vector<8xf32>
      %69 = vector.multi_reduction <add>, %68, %cst_46 [1] : vector<8x32xf32> to vector<8xf32>
      %70 = vector.shape_cast %69 : vector<8xf32> to vector<8x1xf32>
      %cst_47 = arith.constant 1.000000e+00 : f32
      %71 = vector.broadcast %cst_47 : f32 to vector<1x32xf32>
      %cst_48 = arith.constant dense<0.000000e+00> : vector<1x8xf32>
      %72 = tpu.matmul %71, %68, %cst_48 {dimension_numbers = #tpu.dot_dimension_numbers<[1], [1], [0], [0], [0, 0, 1, 0], [], []>} : vector<1x32xf32>, vector<8x32xf32>, vector<1x8xf32> -> vector<1x8xf32>
      %cst_49 = arith.constant dense<0.000000e+00> : vector<8x8xf32>
      %73 = tpu.matmul %67, %67, %cst_49 {dimension_numbers = #tpu.dot_dimension_numbers<[1], [1], [0], [0], [0, 0, 1, 0], [], []>} : vector<8x32xf32>, vector<8x32xf32>, vector<8x8xf32> -> vector<8x8xf32>
      %74 = vector.broadcast %70 : vector<8x1xf32> to vector<8x8xf32>
      %75 = vector.broadcast %72 : vector<1x8xf32> to vector<8x8xf32>
      %76 = arith.addf %74, %75 : vector<8x8xf32>
      %cst_50 = arith.constant 2.000000e+00 : f32
      %77 = vector.broadcast %cst_50 : f32 to vector<8x8xf32>
      %78 = arith.mulf %77, %73 : vector<8x8xf32>
      %79 = arith.subf %76, %78 : vector<8x8xf32>
      %cst_51 = arith.constant 0.000000e+00 : f32
      %80 = vector.broadcast %cst_51 : f32 to vector<8x8xf32>
      %81 = arith.maximumf %79, %80 : vector<8x8xf32>
      %c0_52 = arith.constant 0 : index
      %c0_53 = arith.constant 0 : index
      %82 = vector.load %arg4[%c0_52, %c0_53] : memref<8x1xi32, #tpu.memory_space<vmem>>, vector<8x1xi32>
      %c0_54 = arith.constant 0 : index
      %c0_55 = arith.constant 0 : index
      %83 = vector.load %arg5[%c0_54, %c0_55] : memref<1x8xi32, #tpu.memory_space<vmem>>, vector<1x8xi32>
      %84 = vector.broadcast %82 : vector<8x1xi32> to vector<8x8xi32>
      %85 = vector.broadcast %83 : vector<1x8xi32> to vector<8x8xi32>
      %86 = arith.cmpi eq, %84, %85 : vector<8x8xi32>
      %cst_56 = arith.constant 0.000000e+00 : f32
      %87 = vector.broadcast %cst_56 : f32 to vector<8x8xf32>
      %88 = arith.select %86, %81, %87 : vector<8x8xi1>, vector<8x8xf32>
      %cst_57 = arith.constant dense<0xFF800000> : vector<8xf32>
      %89 = vector.multi_reduction <maximumf>, %88, %cst_57 [1] : vector<8x8xf32> to vector<8xf32>
      %90 = vector.shape_cast %89 : vector<8xf32> to vector<8x1xf32>
      %cst_58 = arith.constant 9.99999984E+17 : f32
      %91 = vector.broadcast %cst_58 : f32 to vector<8x8xf32>
      %92 = arith.select %86, %91, %81 : vector<8x8xi1>, vector<8x8xf32>
      %cst_59 = arith.constant dense<0x7F800000> : vector<8xf32>
      %93 = vector.multi_reduction <minimumf>, %92, %cst_59 [1] : vector<8x8xf32> to vector<8xf32>
      %94 = vector.shape_cast %93 : vector<8xf32> to vector<8x1xf32>
      %cst_60 = arith.constant 9.99999996E-13 : f32
      %95 = vector.broadcast %cst_60 : f32 to vector<8x1xf32>
      %96 = arith.addf %90, %95 : vector<8x1xf32>
      %97 = math.sqrt %96 : vector<8x1xf32>
      %cst_61 = arith.constant 9.99999996E-13 : f32
      %98 = vector.broadcast %cst_61 : f32 to vector<8x1xf32>
      %99 = arith.addf %94, %98 : vector<8x1xf32>
      %100 = math.sqrt %99 : vector<8x1xf32>
      %101 = arith.subf %97, %100 : vector<8x1xf32>
      %cst_62 = arith.constant 3.000000e-01 : f32
      %102 = vector.broadcast %cst_62 : f32 to vector<8x1xf32>
      %103 = arith.addf %101, %102 : vector<8x1xf32>
      %cst_63 = arith.constant 0.000000e+00 : f32
      %104 = vector.broadcast %cst_63 : f32 to vector<8x1xf32>
      %105 = arith.maximumf %103, %104 : vector<8x1xf32>
      %cst_64 = arith.constant dense<0.000000e+00> : vector<1xf32>
      %106 = vector.multi_reduction <add>, %105, %cst_64 [0] : vector<8x1xf32> to vector<1xf32>
      %107 = vector.shape_cast %106 : vector<1xf32> to vector<1x1xf32>
      %cst_65 = arith.constant 8.000000e+00 : f32
      %108 = vector.broadcast %cst_65 : f32 to vector<1x1xf32>
      %109 = arith.divf %107, %108 : vector<1x1xf32>
      %c0_66 = arith.constant 0 : index
      %c0_67 = arith.constant 0 : index
      %c0_68 = arith.constant 0 : index
      %110 = vector.load %arg9[%c0_66, %c0_67, %c0_68] : memref<1x1x1xf32, #tpu.memory_space<vmem>>, vector<1x1x1xf32>
      %111 = vector.shape_cast %110 : vector<1x1x1xf32> to vector<1x1xf32>
      %112 = vector.shape_cast %109 : vector<1x1xf32> to vector<1x1x1xf32>
      tpu.vector_store %arg9[%c0_66, %c0_67, %c0_68], %112 {strides = array<i32>} : memref<1x1x1xf32, #tpu.memory_space<vmem>>, vector<1x1x1xf32>,
    } else {
    }
    %c0 = arith.constant 0 : index
    %c0_1 = arith.constant 0 : index
    %5 = vector.load %arg3[%c0, %c0_1] : memref<8x4xf32, #tpu.memory_space<vmem>>, vector<8x4xf32>
    %6 = tpu.iota {dimensions = array<i32: 1>} : vector<8x4xi32>
    %c4_i32 = arith.constant 4 : i32
    %7 = arith.muli %1, %c4_i32 : i32
    %c4_i32_2 = arith.constant 4 : i32
    %8 = arith.subi %c4_i32_2, %7 : i32
    %9 = vector.broadcast %8 : i32 to vector<8x4xi32>
    %10 = arith.cmpi slt, %6, %9 : vector<8x4xi32>
    %cst = arith.constant 0xFF800000 : f32
    %11 = vector.broadcast %cst : f32 to vector<8x4xf32>
    %12 = arith.select %10, %5, %11 : vector<8x4xi1>, vector<8x4xf32>
    %cst_3 = arith.constant dense<0xFF800000> : vector<8xf32>
    %13 = vector.multi_reduction <maximumf>, %12, %cst_3 [1] : vector<8x4xf32> to vector<8xf32>
    %14 = vector.shape_cast %13 : vector<8xf32> to vector<8x1xf32>
    %c0_4 = arith.constant 0 : index
    %c0_5 = arith.constant 0 : index
    %c0_6 = arith.constant 0 : index
    %15 = vector.load %arg6[%c0_4, %c0_5, %c0_6] : memref<1x8x1xf32, #tpu.memory_space<vmem>>, vector<1x8x1xf32>
    %16 = vector.shape_cast %15 : vector<1x8x1xf32> to vector<8x1xf32>
    %17 = arith.maximumf %16, %14 : vector<8x1xf32>
    %c0_7 = arith.constant 0 : index
    %c0_8 = arith.constant 0 : index
    %c0_9 = arith.constant 0 : index
    %18 = vector.load %arg6[%c0_7, %c0_8, %c0_9] : memref<1x8x1xf32, #tpu.memory_space<vmem>>, vector<1x8x1xf32>
    %19 = vector.shape_cast %18 : vector<1x8x1xf32> to vector<8x1xf32>
    %20 = arith.subf %19, %17 : vector<8x1xf32>
    %21 = math.exp %20 : vector<8x1xf32>
    %22 = vector.broadcast %17 : vector<8x1xf32> to vector<8x4xf32>
    %23 = arith.subf %5, %22 : vector<8x4xf32>
    %24 = math.exp %23 : vector<8x4xf32>
    %cst_10 = arith.constant 0.000000e+00 : f32
    %25 = vector.broadcast %cst_10 : f32 to vector<8x4xf32>
    %26 = arith.select %10, %24, %25 : vector<8x4xi1>, vector<8x4xf32>
    %c0_11 = arith.constant 0 : index
    %c0_12 = arith.constant 0 : index
    %c0_13 = arith.constant 0 : index
    %27 = vector.load %arg7[%c0_11, %c0_12, %c0_13] : memref<1x8x1xf32, #tpu.memory_space<vmem>>, vector<1x8x1xf32>
    %28 = vector.shape_cast %27 : vector<1x8x1xf32> to vector<8x1xf32>
    %29 = arith.mulf %28, %21 : vector<8x1xf32>
    %cst_14 = arith.constant dense<0.000000e+00> : vector<8xf32>
    %30 = vector.multi_reduction <add>, %26, %cst_14 [1] : vector<8x4xf32> to vector<8xf32>
    %31 = vector.shape_cast %30 : vector<8xf32> to vector<8x1xf32>
    %32 = arith.addf %29, %31 : vector<8x1xf32>
    %c0_15 = arith.constant 0 : index
    %c0_16 = arith.constant 0 : index
    %c0_17 = arith.constant 0 : index
    %33 = vector.load %arg7[%c0_15, %c0_16, %c0_17] : memref<1x8x1xf32, #tpu.memory_space<vmem>>, vector<1x8x1xf32>
    %34 = vector.shape_cast %33 : vector<1x8x1xf32> to vector<8x1xf32>
    %35 = vector.shape_cast %32 : vector<8x1xf32> to vector<1x8x1xf32>
    tpu.vector_store %arg7[%c0_15, %c0_16, %c0_17], %35 {strides = array<i32>} : memref<1x8x1xf32, #tpu.memory_space<vmem>>, vector<1x8x1xf32>,
    %c0_18 = arith.constant 0 : index
    %c0_19 = arith.constant 0 : index
    %c0_20 = arith.constant 0 : index
    %36 = vector.load %arg6[%c0_18, %c0_19, %c0_20] : memref<1x8x1xf32, #tpu.memory_space<vmem>>, vector<1x8x1xf32>
    %37 = vector.shape_cast %36 : vector<1x8x1xf32> to vector<8x1xf32>
    %38 = vector.shape_cast %17 : vector<8x1xf32> to vector<1x8x1xf32>
    tpu.vector_store %arg6[%c0_18, %c0_19, %c0_20], %38 {strides = array<i32>} : memref<1x8x1xf32, #tpu.memory_space<vmem>>, vector<1x8x1xf32>,
    %c0_21 = arith.constant 0 : index
    %c0_22 = arith.constant 0 : index
    %39 = vector.load %arg4[%c0_21, %c0_22] : memref<8x1xi32, #tpu.memory_space<vmem>>, vector<8x1xi32>
    %c4_i32_23 = arith.constant 4 : i32
    %40 = arith.muli %1, %c4_i32_23 : i32
    %41 = vector.broadcast %40 : i32 to vector<8x1xi32>
    %42 = arith.subi %39, %41 : vector<8x1xi32>
    %c0_24 = arith.constant 0 : index
    %c0_25 = arith.constant 0 : index
    %c0_26 = arith.constant 0 : index
    %43 = vector.load %arg8[%c0_24, %c0_25, %c0_26] : memref<1x8x1xf32, #tpu.memory_space<vmem>>, vector<1x8x1xf32>
    %44 = vector.shape_cast %43 : vector<1x8x1xf32> to vector<8x1xf32>
    %45 = vector.broadcast %42 : vector<8x1xi32> to vector<8x4xi32>
    %46 = arith.cmpi eq, %6, %45 : vector<8x4xi32>
    %cst_27 = arith.constant 0.000000e+00 : f32
    %47 = vector.broadcast %cst_27 : f32 to vector<8x4xf32>
    %48 = arith.select %46, %5, %47 : vector<8x4xi1>, vector<8x4xf32>
    %cst_28 = arith.constant dense<0.000000e+00> : vector<8xf32>
    %49 = vector.multi_reduction <add>, %48, %cst_28 [1] : vector<8x4xf32> to vector<8xf32>
    %50 = vector.shape_cast %49 : vector<8xf32> to vector<8x1xf32>
    %51 = arith.addf %44, %50 : vector<8x1xf32>
    %c0_29 = arith.constant 0 : index
    %c0_30 = arith.constant 0 : index
    %c0_31 = arith.constant 0 : index
    %52 = vector.load %arg8[%c0_29, %c0_30, %c0_31] : memref<1x8x1xf32, #tpu.memory_space<vmem>>, vector<1x8x1xf32>
    %53 = vector.shape_cast %52 : vector<1x8x1xf32> to vector<8x1xf32>
    %54 = vector.shape_cast %51 : vector<8x1xf32> to vector<1x8x1xf32>
    tpu.vector_store %arg8[%c0_29, %c0_30, %c0_31], %54 {strides = array<i32>} : memref<1x8x1xf32, #tpu.memory_space<vmem>>, vector<1x8x1xf32>,
    return
  }
  func.func @transform_0(%arg0: i32, %arg1: i32) -> (i32, i32) {
    %c0_i32 = arith.constant 0 : i32
    %c0_i32_0 = arith.constant 0 : i32
    %c0_i32_1 = arith.constant 0 : i32
    return %c0_i32, %c0_i32_0 : i32, i32
  }
  func.func @transform_1(%arg0: i32, %arg1: i32) -> (i32, i32) {
    %c1_i32 = arith.constant 1 : i32
    %0 = arith.muli %arg0, %c1_i32 : i32
    %1 = arith.addi %0, %arg1 : i32
    %c0_i32 = arith.constant 0 : i32
    %2 = arith.minsi %1, %c0_i32 : i32
    %c0_i32_0 = arith.constant 0 : i32
    %c0_i32_1 = arith.constant 0 : i32
    return %c0_i32_0, %2 : i32, i32
  }
  func.func @transform_2(%arg0: i32, %arg1: i32) -> (i32, i32) {
    %c0_i32 = arith.constant 0 : i32
    %c0_i32_0 = arith.constant 0 : i32
    %c0_i32_1 = arith.constant 0 : i32
    return %c0_i32, %c0_i32_0 : i32, i32
  }
  func.func @transform_3(%arg0: i32, %arg1: i32) -> (i32, i32) {
    %c0_i32 = arith.constant 0 : i32
    %c0_i32_0 = arith.constant 0 : i32
    %c0_i32_1 = arith.constant 0 : i32
    return %c0_i32, %c0_i32_0 : i32, i32
  }
  func.func @transform_4(%arg0: i32, %arg1: i32) -> (i32, i32, i32) {
    %c0_i32 = arith.constant 0 : i32
    %c0_i32_0 = arith.constant 0 : i32
    %c0_i32_1 = arith.constant 0 : i32
    return %arg0, %c0_i32, %c0_i32_0 : i32, i32, i32
  }
  func.func @transform_5(%arg0: i32, %arg1: i32) -> (i32, i32, i32) {
    %c0_i32 = arith.constant 0 : i32
    %c0_i32_0 = arith.constant 0 : i32
    %c0_i32_1 = arith.constant 0 : i32
    return %arg0, %c0_i32, %c0_i32_0 : i32, i32, i32
  }
  func.func @transform_6(%arg0: i32, %arg1: i32) -> (i32, i32, i32) {
    %c0_i32 = arith.constant 0 : i32
    %c0_i32_0 = arith.constant 0 : i32
    %c0_i32_1 = arith.constant 0 : i32
    return %arg0, %c0_i32, %c0_i32_0 : i32, i32, i32
  }
  func.func @transform_7(%arg0: i32, %arg1: i32) -> (i32, i32, i32) {
    %c0_i32 = arith.constant 0 : i32
    %c0_i32_0 = arith.constant 0 : i32
    %c0_i32_1 = arith.constant 0 : i32
    return %arg0, %c0_i32, %c0_i32_0 : i32, i32, i32
  }
}

</mosaic_0001>

<bundles_post_ra>
// kernel: tpu_custom_call.1
= control target key start
LH: loop header
LB: loop body
LE: loop exit
PB: predicated region body
PF: predicated region fallthrough
CT: control target
= control target key end

     0   :  { %v180_v0 = vlaneseq  ;;  %vm60_vm0 = vcmask 261120   ;;  %s427_s0 = inlined_call_operand.vmem [shape: f32[8,32], index: 0, kind: input, shape index: {}]   ;;  %s428_s1 = inlined_call_operand.vmem [shape: f32[8,4], index: 1, kind: input, shape index: {}]   ;;  %s429_s2 = inlined_call_operand.vmem [shape: s32[8,1], index: 2, kind: input, shape index: {}]   ;;  %s430_s3 = inlined_call_operand.vmem [shape: s32[1,8], index: 3, kind: input, shape index: {}]   ;;  %s431_s4 = inlined_call_operand.vmem [shape: f32[1,8,1], index: 4, kind: output, shape index: {0}]   ;;  %s432_s5 = inlined_call_operand.vmem [shape: f32[1,8,1], index: 5, kind: output, shape index: {1}]   ;;  %s433_s6 = inlined_call_operand.vmem [shape: f32[1,8,1], index: 6, kind: output, shape index: {2}]   ;;  %s434_s7 = inlined_call_operand.hbm [shape: f32[1,1,1], index: 7, kind: output, shape index: {3}]  }
   0x1   :  { %v58_v1 = vld [vmem:[%s427_s0] sm:$0xff] }
   0x2   :  { %v118_v2 = vld [vmem:[%s429_s2] sm:$0xff]  ;;  %v59_v3 = vmul.f32 %v58_v1, %v58_v1  ;;  %264 = vmatpush.xpose.msk.msra.mxu1 %vm60_vm0, %v58_v1 }
   0x3   :  { %13 = vsyncpa [#allocation3], 0  ;;  %v179_v4 = vld [vmem:[%s428_s1] sm:$0xff]  ;;  %v181_v5 = vand.u32 127, %v180_v0  ;;  %v311_v6 = vmov 0   ;;  %vm187_vm1 = vcmask 31744  }
   0x4   :  { %272 = vset.pattern.permute.xlu1 %v311_v6  ;;  %273 = vset.pattern.permute.xlu0 %v311_v6  ;;  %v312_v9 = vmov 1.0   ;;  %v61_v10 = vsel %vm60_vm0, %v59_v3, 0.0  ;;  %vm54_vm3 = vcmask 7168   ;;  %v313_v11 = vmov -3.4028235e+38   ;;  %s241_s18 = sshll.u32 %s434_s7, 4  ;;  %s242_s18 = int_to_ptr.hbm [resolvable:$true] %s241_s18 }
   0x5   :  { %262 = vmatpush.xpose.msk.msra.mxu0 %vm60_vm0, %v59_v3  ;;  %121 = vperm.xlu1 %272, %v118_v2   ;;  %vm185_vm2 = vcmp.lt.s32.totalorder %v181_v5, 4  ;;  %55 = vst.msk [vmem:[%s431_s4] sm:$0xff] %vm54_vm3, %v313_v11  ;;  %v314_v12 = vmov 0.0   ;;  %v274_v22 = vld [vmem:[%s430_s3] ss:$0 sm:$0xff]  ;;  %vm126_vm5 = vcmask 64512  }
   0x6   :  { %265 = vmatmul.msk.f32.vlgmr.msra.gmra.mxu1 %vm60_vm0, %v58_v1  ;;  %v186_v7 = vsel %vm185_vm2, %v179_v4, -inf  ;;  %57 = vst.msk [vmem:[%s433_s6] sm:$0xff] %vm54_vm3, %v314_v12  ;;  %v315_v63 = vmov 8.0   ;;  %s316_s3 = smov [#allocation2]   ;;  %vm177_vm12 = vcmask 0  }
   0x7   :  { %v188_v8 = vsel %vm187_vm1, %v186_v7, -inf  ;;  %56 = vst.msk [vmem:[%s432_s5] sm:$0xff] %vm54_vm3, %v314_v12 }
   0x8   :  { %263 = vmatmul.msk.f32.vlgmr.msra.gmra.mxu0 %vm60_vm0, %v312_v9  ;;  %189 = vmax.xlane.f32.xlu0 %v188_v8 }
   0xc   :  { %v388_v13 = vld [vmem:[%s431_s4] sm:$0xff] }
  0x10   :  { %62 = vadd.xlane.f32.xlu0 %v61_v10 }
  0x24   :  { %219 = vperm.xlu0 %273, %v118_v2  }
  0x77   :  { %v122_v24 = vpop.permute.xlu1 %121 }
  0x78   :  { %vm124_vm4 = vcmp.eq.s32.totalorder %v122_v24, %v274_v22 }
  0x7b   :  { %v190_v14 = vpop.xlane.xlu0 %189 }
  0x7c   :  { %v391_v15 = vmax.f32 %v388_v13, %v190_v14 }
  0x7e   :  { %v193_v16 = vsub.f32 %v388_v13, %v391_v15  ;;  %213 = vst.msk [vmem:[%s431_s4] sm:$0xff] %vm54_vm3, %v391_v15  ;;  %198 = vperm.xlu1 %272, %v391_v15   ;;  %s239_s4 = sshll.u32 %s316_s3, 4  ;;  %s240_s4 = int_to_ptr.vmem [resolvable:$true] %s239_s4 }
  0x83   :  { %v110_v17 = vpop.f32.mrf.mxu1  ;;  %v63_v19 = vpop.xlane.xlu0 %62 }
  0x84   :  { %v115_v21 = vmul.f32 2.0, %v110_v17 }
  0x85   :  { %v87_v18 = vpop.f32.mrf.mxu0 }
  0x86   :  { %v113_v20 = vperm.slane %v87_v18, 0 }
  0x88   :  { %v114_v23 = vadd.f32 %v113_v20, %v63_v19  ;;  %v217_v20 = vld [vmem:[%s433_s6] sm:$0xff] }
  0x8a   :  { %v116_v25 = vsub.f32 %v114_v23, %v115_v21  ;;  %v194_v23 = vmul.f32 1.442695, %v193_v16 }
  0x8c   :  { %v117_v26 = vmax.f32 %v116_v25, 0.0  ;;  %v205_v25 = vld [vmem:[%s432_s5] sm:$0xff] }
  0x8e   :  { %v125_v27 = vsel %vm124_vm4, %v117_v26, 0.0  ;;  %v130_v29 = vsel %vm124_vm4, 1e+18, %v117_v26 }
  0x8f   :  { %v127_v28 = vsel %vm126_vm5, %v125_v27, -inf  ;;  %v131_v30 = vsel %vm126_vm5, %v130_v29, inf }
  0x90   :  { %128 = vmax.xlane.f32.xlu2 %v127_v28 }
  0x96   :  { %v220_v31 = vpop.permute.xlu0 %219 }
  0x97   :  { %vm221_vm6 = vcmp.eq.s32.totalorder %v181_v5, %v220_v31 }
  0x98   :  { %132 = vmin.xlane.f32.xlu2 %v131_v30  ;;  %v222_v32 = vsel %vm221_vm6, %v179_v4, 0.0 }
  0x99   :  { %v223_v33 = vsel %vm187_vm1, %v222_v32, 0.0 }
  0xa0   :  { %224 = vadd.xlane.f32.xlu2 %v223_v33 }
  0xf0   :  { %v199_v34 = vpop.permute.xlu1 %198 }
  0xf1   :  { %v201_v35 = vsub.f32 %v179_v4, %v199_v34 }
  0xf3   :  { %v202_v36 = vmul.f32 1.442695, %v201_v35 }
  0xf5   :  { %275 = vpow2.f32 %v202_v36 }
  0xfb   :  { %v276_v37 = vpop.eup %275 }
  0xfc   :  { %v204_v38 = vsel %vm185_vm2, %v276_v37, 0.0 }
  0xfd   :  { %v207_v39 = vsel %vm187_vm1, %v204_v38, 0.0 }
  0xfe   :  { %208 = vadd.xlane.f32.xlu1 %v207_v39 }
 0x103   :  { %v129_v40 = vpop.xlane.xlu2 %128 }
 0x104   :  { %v134_v41 = vadd.f32 1e-12, %v129_v40 }
 0x106   :  { %277 = vrsqrt.f32 %v134_v41  ;;  %vm142_vm7 = vcmp.eq.f32.partialorder %v134_v41, inf  ;;  %v145_v56 = vand.u32 2147483648, %v134_v41  ;;  %vm144_vm8 = vcmp.eq.f32.partialorder %v134_v41, 0.0 }
 0x10b   :  { %v133_v42 = vpop.xlane.xlu2 %132 }
 0x10c   :  { %v278_v43 = vpop.eup %277  ;;  %v147_v44 = vadd.f32 1e-12, %v133_v42 }
 0x10d   :  { %v136_v45 = vmul.f32 %v278_v43, %v134_v41 }
 0x10e   :  { %279 = vrsqrt.f32 %v147_v44  ;;  %vm155_vm9 = vcmp.eq.f32.partialorder %v147_v44, inf  ;;  %v158_v59 = vand.u32 2147483648, %v147_v44  ;;  %vm157_vm10 = vcmp.eq.f32.partialorder %v147_v44, 0.0 }
 0x10f   :  { %v137_v46 = vmul.f32 %v278_v43, %v136_v45  ;;  %281 = vrcp.f32 %v315_v63 }
 0x110   :  { %283 = vpow2.f32 %v194_v23 }
 0x111   :  { %v138_v49 = vmul.f32 0.5, %v137_v46 }
 0x113   :  { %v139_v51 = vsub.f32 1.5, %v138_v49  ;;  %v225_v21 = vpop.xlane.xlu2 %224 }
 0x114   :  { %v280_v47 = vpop.eup %279  ;;  %v226_v22 = vadd.f32 %v225_v21, %v217_v20 }
 0x115   :  { %v149_v48 = vmul.f32 %v280_v47, %v147_v44  ;;  %v140_v52 = vmul.f32 %v278_v43, %v139_v51  ;;  %v282_v3 = vpop.eup %281 }
 0x116   :  { %v170_v5 = vmul.f32 8.0, %v282_v3  ;;  %vm174_vm11 = vweird.f32 %v282_v3  ;;  %227 = vst.msk [vmem:[%s433_s6] sm:$0xff] %vm54_vm3, %v226_v22  ;;  %v284_v24 = vpop.eup %283 }
 0x117   :  { %v150_v50 = vmul.f32 %v280_v47, %v149_v48  ;;  %v141_v54 = vmul.f32 %v140_v52, %v134_v41  ;;  %v206_v26 = vmul.f32 %v284_v24, %v205_v25 }
 0x118   :  { %v171_v7 = vsub.f32 1.0, %v170_v5 }
 0x119   :  { %v151_v53 = vmul.f32 0.5, %v150_v50  ;;  %v143_v57 = vsel %vm142_vm7, %v134_v41, %v141_v54 }
 0x11a   :  { %v146_v61 = vsel %vm144_vm8, %v145_v56, %v143_v57  ;;  %v172_v9 = vmul.f32 %v282_v3, %v171_v7 }
 0x11b   :  { %v152_v55 = vsub.f32 1.5, %v151_v53 }
 0x11c   :  { %v173_v11 = vadd.f32 %v282_v3, %v172_v9 }
 0x11d   :  { %v153_v58 = vmul.f32 %v280_v47, %v152_v55 }
 0x11e   :  { %v175_v17 = vsel %vm174_vm11, %v282_v3, %v173_v11 }
 0x11f   :  { %v154_v60 = vmul.f32 %v153_v58, %v147_v44 }
 0x121   :  { %v156_v62 = vsel %vm155_vm9, %v147_v44, %v154_v60 }
 0x122   :  { %v159_v0 = vsel %vm157_vm10, %v158_v59, %v156_v62 }
 0x123   :  { %v160_v1 = vsub.f32 %v146_v61, %v159_v0 }
 0x125   :  { %v161_v2 = vadd.f32 0.3, %v160_v1 }
 0x127   :  { %v162_v4 = vmax.f32 %v161_v2, 0.0 }
 0x129   :  { %v163_v6 = vrot.slane %v162_v4, 4 }
 0x12b   :  { %v164_v8 = vadd.f32 %v163_v6, %v162_v4 }
 0x12d   :  { %v165_v10 = vrot.slane %v164_v8, 2 }
 0x12f   :  { %v166_v12 = vadd.f32 %v165_v10, %v164_v8 }
 0x131   :  { %v167_v14 = vrot.slane %v166_v12, 1 }
 0x133   :  { %v168_v18 = vadd.f32 %v167_v14, %v166_v12 }
 0x135   :  { %v176_v19 = vmul.f32 %v175_v17, %v168_v18 }
 0x137   :  { %178 = vst.msk [vmem:[#allocation2] sm:$0x1] %vm177_vm12, %v176_v19 }
 0x138   :  { %244 = dma.vmem_to_hbm [thread:$0]  %s240_s4, 16, %s242_s18, [#allocation3]  }
 0x171   :  { %v209_v27 = vpop.xlane.xlu1 %208 }
 0x172   :  { %v210_v28 = vadd.f32 %v209_v27, %v206_v26 }
 0x174   :  { %212 = vst.msk [vmem:[%s432_s5] sm:$0xff] %vm54_vm3, %v210_v28 }
 0x175   :  { %309 = dma.done.wait [#allocation3], 16  }
 0x176   :  { %310 = vsyncadd [#allocation3], 4294967280 }
 0x177   :  { %255 = vsyncpa [#allocation3], 1 }

</bundles_post_ra>
